<compile_context>
chip_gen: v7x
topology: tpu7x:2x2x1
jax: 0.10.0
libtpu: 0.0.40
codegen_flags: <defaults>
</compile_context>

<pallas_src>
import functools

import jax
import jax.numpy as jnp
from jax.experimental import pallas as pl
from jax.experimental.pallas import tpu as pltpu

LOG_STD_MAX = 2.0
LOG_STD_MIN = -5.0

HIDDEN = 256
TB_DEFAULT = 256  # batch tile; sized to stay well under v7x's 64 MiB VMEM

# Folded log_std remap constants:  ls = C0 + C1 * tanh(z)
_C1 = 0.5 * (LOG_STD_MAX - LOG_STD_MIN)
_C0 = LOG_STD_MIN + _C1


def _round_up(n, m):
    return ((n + m - 1) // m) * m


def actor_kernel(x_ref, w1_ref, b1_ref, w2_ref, b2_ref, wh_ref, bh_ref,
                 out_ref, *, head_pad):
    # fc1 + relu (bf16 in, f32 accumulate)
    h1 = jnp.dot(x_ref[...], w1_ref[...],
                 preferred_element_type=jnp.float32) + b1_ref[...]
    h1 = jnp.maximum(h1, 0.0).astype(jnp.bfloat16)

    # fc2 + relu
    h2 = jnp.dot(h1, w2_ref[...],
                 preferred_element_type=jnp.float32) + b2_ref[...]
    h2 = jnp.maximum(h2, 0.0).astype(jnp.bfloat16)

    # fused heads: lanes [0, head_pad) = mean, lanes [head_pad, 2*head_pad) = log_std
    z = jnp.dot(h2, wh_ref[...],
                preferred_element_type=jnp.float32) + bh_ref[...]

    ls = _C0 + _C1 * jnp.tanh(z)          # EUP tanh on all lanes (cheap)
    col = jax.lax.broadcasted_iota(jnp.int32, z.shape, 1)
    out = jnp.where(col < head_pad, z, ls)

    out_ref[...] = out.astype(out_ref.dtype)  # single unmasked lane-dense store


def prepare_actor_params(params, act_dim):
    """Fuse + pad head weights, cast matmul operands to bf16."""
    P = _round_up(act_dim, 64)            # per-head lane pad; 2*P is a mult. of 128
    wh = jnp.zeros((HIDDEN, 2 * P), jnp.float32)
    wh = wh.at[:, :act_dim].set(params["wm"])
    wh = wh.at[:, P:P + act_dim].set(params["wl"])
    bh = jnp.zeros((1, 2 * P), jnp.float32)
    bh = bh.at[:, :act_dim].set(params["bm"][0])
    bh = bh.at[:, P:P + act_dim].set(params["bl"][0])
    return {
        "w1": params["w1"].astype(jnp.bfloat16),
        "b1": params["b1"].astype(jnp.float32),
        "w2": params["w2"].astype(jnp.bfloat16),
        "b2": params["b2"].astype(jnp.float32),
        "wh": wh.astype(jnp.bfloat16),
        "bh": bh,
        "act_dim": act_dim,
        "head_pad": P,
    }


def actor_forward(x, kp, *, tb=TB_DEFAULT):
    """x: (B, obs_dim) float32.  kp: output of prepare_actor_params."""
    B, obs_dim = x.shape
    act_dim = kp["act_dim"]
    P = kp["head_pad"]
    out_w = 2 * P

    # Batch tiling (pad B up to a multiple of the tile; tile rows multiple of 8).
    tb = min(tb, _round_up(B, 8))
    b_pad = _round_up(B, tb)
    xb = x.astype(jnp.bfloat16)
    if b_pad != B:
        xb = jnp.pad(xb, ((0, b_pad - B), (0, 0)))

    grid = (b_pad // tb,)
    kernel = functools.partial(actor_kernel, head_pad=P)

    out = pl.pallas_call(
        kernel,
        out_shape=jax.ShapeDtypeStruct((b_pad, out_w), jnp.float32),
        grid_spec=pltpu.PrefetchScalarGridSpec(
            num_scalar_prefetch=0,
            grid=grid,
            in_specs=[
                # batch-tiled activations (pipelined)
                pl.BlockSpec((tb, obs_dim), lambda i: (i, 0)),
                # weights/biases: same block every step -> VMEM resident
                pl.BlockSpec((obs_dim, HIDDEN), lambda i: (0, 0)),
                pl.BlockSpec((1, HIDDEN), lambda i: (0, 0)),
                pl.BlockSpec((HIDDEN, HIDDEN), lambda i: (0, 0)),
                pl.BlockSpec((1, HIDDEN), lambda i: (0, 0)),
                pl.BlockSpec((HIDDEN, out_w), lambda i: (0, 0)),
                pl.BlockSpec((1, out_w), lambda i: (0, 0)),
            ],
            out_specs=pl.BlockSpec((tb, out_w), lambda i: (i, 0)),
        ),
        compiler_params=pltpu.CompilerParams(
            dimension_semantics=("parallel",),   # batch tiles shard across v7x TCs
        ),
    )(xb, kp["w1"], kp["b1"], kp["w2"], kp["b2"], kp["wh"], kp["bh"])

    mean = out[:B, :act_dim]
    log_std = out[:B, P:P + act_dim]
    return mean, log_std


def init_actor_params(key, obs_dim, act_dim):
    """PyTorch-style nn.Linear init (uniform +-1/sqrt(fan_in)); weights stored
    as (in, out) == PyTorch weight.T."""
    def linear(k, fan_in, fan_out):
        kw, kb = jax.random.split(k)
        bound = 1.0 / jnp.sqrt(float(fan_in))
        w = jax.random.uniform(kw, (fan_in, fan_out), jnp.float32, -bound, bound)
        b = jax.random.uniform(kb, (1, fan_out), jnp.float32, -bound, bound)
        return w, b

    k1, k2, k3, k4 = jax.random.split(key, 4)
    w1, b1 = linear(k1, obs_dim, HIDDEN)
    w2, b2 = linear(k2, HIDDEN, HIDDEN)
    wm, bm = linear(k3, HIDDEN, act_dim)
    wl, bl = linear(k4, HIDDEN, act_dim)
    return {"w1": w1, "b1": b1, "w2": w2, "b2": b2,
            "wm": wm, "bm": bm, "wl": wl, "bl": bl}


def actor_forward_ref(x, kp):
    """Pure-JAX reference of the same math (mirrors the kernel's bf16 rounding)."""
    act_dim, P = kp["act_dim"], kp["head_pad"]
    hp = jax.lax.Precision.HIGHEST
    f32 = lambda a: a.astype(jnp.float32)

    xb = f32(x.astype(jnp.bfloat16))
    h1 = jnp.maximum(jnp.dot(xb, f32(kp["w1"]), precision=hp) + kp["b1"], 0.0)
    h1 = f32(h1.astype(jnp.bfloat16))
    h2 = jnp.maximum(jnp.dot(h1, f32(kp["w2"]), precision=hp) + kp["b2"], 0.0)
    h2 = f32(h2.astype(jnp.bfloat16))
    z = jnp.dot(h2, f32(kp["wh"]), precision=hp) + kp["bh"]
    mean = z[:, :act_dim]
    ls = LOG_STD_MIN + 0.5 * (LOG_STD_MAX - LOG_STD_MIN) * (
        jnp.tanh(z[:, P:P + act_dim]) + 1.0)
    return mean, ls


if __name__ == "__main__":
    # Small shapes consistent with a continuous-control env:
    # observation dim 16, action dim 8.
    OBS_DIM, ACT_DIM = 16, 8

    key = jax.random.PRNGKey(0)
    kx, kp = jax.random.split(key)
    params = init_actor_params(kp, OBS_DIM, ACT_DIM)
    kparams = prepare_actor_params(params, ACT_DIM)

    # B=8 exercises the single-tile path; B=300 exercises the batch grid
    # (2 tiles of 256 rows) plus the padding/slicing logic.
    for B in (8, 300):
        x = jax.random.normal(jax.random.fold_in(kx, B), (B, OBS_DIM),
                              dtype=jnp.float32)
        mean, log_std = jax.block_until_ready(actor_forward(x, kparams))

        mean_ref, log_std_ref = actor_forward_ref(x, kparams)
        assert mean.shape == (B, ACT_DIM) and log_std.shape == (B, ACT_DIM)
        assert jnp.allclose(mean, mean_ref, atol=2e-2, rtol=2e-2)
        assert jnp.allclose(log_std, log_std_ref, atol=2e-2, rtol=2e-2)
        assert jnp.all(log_std >= LOG_STD_MIN) and jnp.all(log_std <= LOG_STD_MAX)

    # TODO(synk): get_action's rsample/log_prob (stochastic sampling) is not part
    # of forward(); it is left to host-side JAX if needed.
    print("KERNEL_OK")
</pallas_src>

<mosaic_0001>
module attributes {stable_mosaic.version = 11 : i64} {
  func.func @actor_kernel(%arg0: i32, %arg1: memref<8x16xbf16, #tpu.memory_space<vmem>>, %arg2: memref<16x256xbf16, #tpu.memory_space<vmem>>, %arg3: memref<1x256xf32, #tpu.memory_space<vmem>>, %arg4: memref<256x256xbf16, #tpu.memory_space<vmem>>, %arg5: memref<1x256xf32, #tpu.memory_space<vmem>>, %arg6: memref<256x128xbf16, #tpu.memory_space<vmem>>, %arg7: memref<1x128xf32, #tpu.memory_space<vmem>>, %arg8: memref<8x128xf32, #tpu.memory_space<vmem>>) attributes {dimension_semantics = [#tpu.dimension_semantics<parallel>], iteration_bounds = array<i64: 1>, scalar_prefetch = 0 : i64, scratch_operands = 0 : i64, tpu.core_type = #tpu.core_type<tc>, window_params = [{transform_indices = @transform_0, window_bounds = array<i64: 8, 16>}, {pipeline_mode = #tpu.pipeline_mode<synchronous>, transform_indices = @transform_1, window_bounds = array<i64: 16, 256>}, {pipeline_mode = #tpu.pipeline_mode<synchronous>, transform_indices = @transform_2, window_bounds = array<i64: 1, 256>}, {pipeline_mode = #tpu.pipeline_mode<synchronous>, transform_indices = @transform_3, window_bounds = array<i64: 256, 256>}, {pipeline_mode = #tpu.pipeline_mode<synchronous>, transform_indices = @transform_4, window_bounds = array<i64: 1, 256>}, {pipeline_mode = #tpu.pipeline_mode<synchronous>, transform_indices = @transform_5, window_bounds = array<i64: 256, 128>}, {pipeline_mode = #tpu.pipeline_mode<synchronous>, transform_indices = @transform_6, window_bounds = array<i64: 1, 128>}, {transform_indices = @transform_7, window_bounds = array<i64: 8, 128>}]} {
    %c0 = arith.constant 0 : index
    %c0_0 = arith.constant 0 : index
    %0 = vector.load %arg1[%c0, %c0_0] : memref<8x16xbf16, #tpu.memory_space<vmem>>, vector<8x16xbf16>
    %c0_1 = arith.constant 0 : index
    %c0_2 = arith.constant 0 : index
    %1 = vector.load %arg2[%c0_1, %c0_2] : memref<16x256xbf16, #tpu.memory_space<vmem>>, vector<16x256xbf16>
    %cst = arith.constant dense<0.000000e+00> : vector<8x256xf32>
    %2 = tpu.matmul %0, %1, %cst {dimension_numbers = #tpu.dot_dimension_numbers<[1], [0], [0], [1], [0, 0, 1, 1], [], []>} : vector<8x16xbf16>, vector<16x256xbf16>, vector<8x256xf32> -> vector<8x256xf32>
    %c0_3 = arith.constant 0 : index
    %c0_4 = arith.constant 0 : index
    %3 = vector.load %arg3[%c0_3, %c0_4] : memref<1x256xf32, #tpu.memory_space<vmem>>, vector<1x256xf32>
    %4 = vector.broadcast %3 : vector<1x256xf32> to vector<8x256xf32>
    %5 = arith.addf %2, %4 : vector<8x256xf32>
    %cst_5 = arith.constant 0.000000e+00 : f32
    %6 = vector.broadcast %cst_5 : f32 to vector<8x256xf32>
    %7 = arith.maximumf %5, %6 : vector<8x256xf32>
    %8 = arith.truncf %7 : vector<8x256xf32> to vector<8x256xbf16>
    %c0_6 = arith.constant 0 : index
    %c0_7 = arith.constant 0 : index
    %9 = vector.load %arg4[%c0_6, %c0_7] : memref<256x256xbf16, #tpu.memory_space<vmem>>, vector<256x256xbf16>
    %cst_8 = arith.constant dense<0.000000e+00> : vector<8x256xf32>
    %10 = tpu.matmul %8, %9, %cst_8 {dimension_numbers = #tpu.dot_dimension_numbers<[1], [0], [0], [1], [0, 0, 1, 1], [], []>} : vector<8x256xbf16>, vector<256x256xbf16>, vector<8x256xf32> -> vector<8x256xf32>
    %c0_9 = arith.constant 0 : index
    %c0_10 = arith.constant 0 : index
    %11 = vector.load %arg5[%c0_9, %c0_10] : memref<1x256xf32, #tpu.memory_space<vmem>>, vector<1x256xf32>
    %12 = vector.broadcast %11 : vector<1x256xf32> to vector<8x256xf32>
    %13 = arith.addf %10, %12 : vector<8x256xf32>
    %cst_11 = arith.constant 0.000000e+00 : f32
    %14 = vector.broadcast %cst_11 : f32 to vector<8x256xf32>
    %15 = arith.maximumf %13, %14 : vector<8x256xf32>
    %16 = arith.truncf %15 : vector<8x256xf32> to vector<8x256xbf16>
    %c0_12 = arith.constant 0 : index
    %c0_13 = arith.constant 0 : index
    %17 = vector.load %arg6[%c0_12, %c0_13] : memref<256x128xbf16, #tpu.memory_space<vmem>>, vector<256x128xbf16>
    %cst_14 = arith.constant dense<0.000000e+00> : vector<8x128xf32>
    %18 = tpu.matmul %16, %17, %cst_14 {dimension_numbers = #tpu.dot_dimension_numbers<[1], [0], [0], [1], [0, 0, 1, 1], [], []>} : vector<8x256xbf16>, vector<256x128xbf16>, vector<8x128xf32> -> vector<8x128xf32>
    %c0_15 = arith.constant 0 : index
    %c0_16 = arith.constant 0 : index
    %19 = vector.load %arg7[%c0_15, %c0_16] : memref<1x128xf32, #tpu.memory_space<vmem>>, vector<1x128xf32>
    %20 = vector.broadcast %19 : vector<1x128xf32> to vector<8x128xf32>
    %21 = arith.addf %18, %20 : vector<8x128xf32>
    %22 = math.tanh %21 : vector<8x128xf32>
    %cst_17 = arith.constant 3.500000e+00 : f32
    %23 = vector.broadcast %cst_17 : f32 to vector<8x128xf32>
    %24 = arith.mulf %23, %22 : vector<8x128xf32>
    %cst_18 = arith.constant -1.500000e+00 : f32
    %25 = vector.broadcast %cst_18 : f32 to vector<8x128xf32>
    %26 = arith.addf %25, %24 : vector<8x128xf32>
    %27 = tpu.iota {dimensions = array<i32: 1>} : vector<8x128xi32>
    %c64_i32 = arith.constant 64 : i32
    %28 = vector.broadcast %c64_i32 : i32 to vector<8x128xi32>
    %29 = arith.cmpi slt, %27, %28 : vector<8x128xi32>
    %30 = arith.select %29, %21, %26 : vector<8x128xi1>, vector<8x128xf32>
    %c0_19 = arith.constant 0 : index
    %c0_20 = arith.constant 0 : index
    %31 = vector.load %arg8[%c0_19, %c0_20] : memref<8x128xf32, #tpu.memory_space<vmem>>, vector<8x128xf32>
    tpu.vector_store %arg8[%c0_19, %c0_20], %30 {strides = array<i32>} : memref<8x128xf32, #tpu.memory_space<vmem>>, vector<8x128xf32>,
    return
  }
  func.func @transform_0(%arg0: i32) -> (i32, i32) {
    %c0_i32 = arith.constant 0 : i32
    %c0_i32_0 = arith.constant 0 : i32
    return %arg0, %c0_i32 : i32, i32
  }
  func.func @transform_1(%arg0: i32) -> (i32, i32) {
    %c0_i32 = arith.constant 0 : i32
    %c0_i32_0 = arith.constant 0 : i32
    %c0_i32_1 = arith.constant 0 : i32
    return %c0_i32, %c0_i32_0 : i32, i32
  }
  func.func @transform_2(%arg0: i32) -> (i32, i32) {
    %c0_i32 = arith.constant 0 : i32
    %c0_i32_0 = arith.constant 0 : i32
    %c0_i32_1 = arith.constant 0 : i32
    return %c0_i32, %c0_i32_0 : i32, i32
  }
  func.func @transform_3(%arg0: i32) -> (i32, i32) {
    %c0_i32 = arith.constant 0 : i32
    %c0_i32_0 = arith.constant 0 : i32
    %c0_i32_1 = arith.constant 0 : i32
    return %c0_i32, %c0_i32_0 : i32, i32
  }
  func.func @transform_4(%arg0: i32) -> (i32, i32) {
    %c0_i32 = arith.constant 0 : i32
    %c0_i32_0 = arith.constant 0 : i32
    %c0_i32_1 = arith.constant 0 : i32
    return %c0_i32, %c0_i32_0 : i32, i32
  }
  func.func @transform_5(%arg0: i32) -> (i32, i32) {
    %c0_i32 = arith.constant 0 : i32
    %c0_i32_0 = arith.constant 0 : i32
    %c0_i32_1 = arith.constant 0 : i32
    return %c0_i32, %c0_i32_0 : i32, i32
  }
  func.func @transform_6(%arg0: i32) -> (i32, i32) {
    %c0_i32 = arith.constant 0 : i32
    %c0_i32_0 = arith.constant 0 : i32
    %c0_i32_1 = arith.constant 0 : i32
    return %c0_i32, %c0_i32_0 : i32, i32
  }
  func.func @transform_7(%arg0: i32) -> (i32, i32) {
    %c0_i32 = arith.constant 0 : i32
    %c0_i32_0 = arith.constant 0 : i32
    return %arg0, %c0_i32 : i32, i32
  }
}

</mosaic_0001>

<bundles_post_ra>
// kernel: tpu_custom_call.1
= control target key start
LH: loop header
LB: loop body
LE: loop exit
PB: predicated region body
PF: predicated region fallthrough
CT: control target
= control target key end

     0   :  { %12 = vsyncpa [#allocation3], 0  ;;  %s1000_s0 = inlined_call_operand.hbm [shape: bf16[8,16], index: 0, kind: input, shape index: {}]   ;;  %s1001_s1 = inlined_call_operand.hbm [shape: bf16[16,256], index: 1, kind: input, shape index: {}]   ;;  %s1002_s2 = inlined_call_operand.vmem [shape: f32[1,256], index: 2, kind: input, shape index: {}]   ;;  %s1003_s3 = inlined_call_operand.hbm [shape: bf16[256,256], index: 3, kind: input, shape index: {}]   ;;  %s1004_s4 = inlined_call_operand.vmem [shape: f32[1,256], index: 4, kind: input, shape index: {}]   ;;  %s1005_s5 = inlined_call_operand.hbm [shape: bf16[256,128], index: 5, kind: input, shape index: {}]   ;;  %s1006_s6 = inlined_call_operand.vmem [shape: f32[1,128], index: 6, kind: input, shape index: {}]   ;;  %s1007_s7 = inlined_call_operand.hbm [shape: f32[8,128], index: 7, kind: output, shape index: {}]  }
   0x1   :  { %13 = vsyncpa [#allocation6], 0 }
   0x2   :  { %14 = vsyncpa [#allocation9], 0 }
   0x3   :  { %15 = vsyncpa [#allocation4], 0  ;;  %s875_s24 = smov [#allocation5]   ;;  %s757_s28 = scalar_lea.hbm %s1001_s1, 256 }
   0x4   :  { %s31_s25 = sshll.u32 %s875_s24, 4  ;;  %p758_p0 = scmp.ne.s32.totalorder %s1001_s1, %s757_s28  ;;  %s32_s25 = int_to_ptr.vmem [resolvable:$true] %s31_s25 }
   0x5   :  { %p761_p1 = scmp.lt.u32.totalorder %s757_s28, %s1001_s1 }
   0x7   :  { %p763_p2 = pnand %p761_p1, %p758_p0 }
   0x9   :  { %766 = shalt.err (!%p763_p2)
}
   0xa   :  { %s767_s10 = scalar_lea.vmem %s32_s25, 256  ;;  %p772_p4 = scmp.lt.s32.totalorder %s32_s25, %s32_s25 }
   0xb   :  { %p768_p3 = scmp.ne.s32.totalorder %s32_s25, %s767_s10  ;;  %p773_p5 = scmp.lt.s32.totalorder %s767_s10, %s767_s10 }
   0xd   :  { %p774_p6 = por %p773_p5, %p772_p4 }
   0xf   :  { %p775_p7 = pnand %p774_p6, %p768_p3 }
  0x11   :  { %778 = shalt.err (!%p775_p7)
}
  0x12   :  { %s876_s11 = smov 128   ;;  %s877_s12 = smov 8  }
  0x13   :  { %37 = dma.hbm_to_vmem [thread:$0]  %s1001_s1, 256, %s32_s25, [#allocation6], %s876_s11, %s876_s11, %s877_s12  }
  0x14   :  { %s878_s15 = smov [#allocation2]   ;;  %s879_s17 = smov [#allocation7]  }
  0x15   :  { %s22_s16 = sshll.u32 %s878_s15, 4  ;;  %s45_s18 = sshll.u32 %s879_s17, 4  ;;  %s23_s16 = int_to_ptr.vmem [resolvable:$true] %s22_s16  ;;  %s46_s18 = int_to_ptr.vmem [resolvable:$true] %s45_s18 }
  0x16   :  { %s779_s21 = scalar_lea.hbm %s1000_s0, 64 }
  0x17   :  { %p780_p8 = scmp.ne.s32.totalorder %s1000_s0, %s779_s21  ;;  %p783_p9 = scmp.lt.u32.totalorder %s779_s21, %s1000_s0 }
  0x19   :  { %p785_p10 = pnand %p783_p9, %p780_p8 }
  0x1b   :  { %788 = shalt.err (!%p785_p10)
}
  0x1c   :  { %s789_s1 = scalar_lea.vmem %s23_s16, 64  ;;  %p794_p12 = scmp.lt.s32.totalorder %s23_s16, %s23_s16 }
  0x1d   :  { %p790_p11 = scmp.ne.s32.totalorder %s23_s16, %s789_s1  ;;  %p795_p13 = scmp.lt.s32.totalorder %s789_s1, %s789_s1 }
  0x1f   :  { %p796_p0 = por %p795_p13, %p794_p12 }
  0x21   :  { %p797_p1 = pnand %p796_p0, %p790_p11 }
  0x23   :  { %800 = shalt.err (!%p797_p1)
}
  0x24   :  { %25 = dma.hbm_to_vmem [thread:$0]  %s1000_s0, 64, %s23_s16, [#allocation3]  }
  0x25   :  { %s801_s30 = scalar_lea.hbm %s1003_s3, 4096 }
  0x26   :  { %p802_p2 = scmp.ne.s32.totalorder %s1003_s3, %s801_s30  ;;  %p805_p3 = scmp.lt.u32.totalorder %s801_s30, %s1003_s3 }
  0x28   :  { %p807_p4 = pnand %p805_p3, %p802_p2 }
  0x2a   :  { %810 = shalt.err (!%p807_p4)
}
  0x2b   :  { %s811_s14 = scalar_lea.vmem %s46_s18, 4096  ;;  %p816_p6 = scmp.lt.s32.totalorder %s46_s18, %s46_s18 }
  0x2c   :  { %p812_p5 = scmp.ne.s32.totalorder %s46_s18, %s811_s14  ;;  %p817_p7 = scmp.lt.s32.totalorder %s811_s14, %s811_s14 }
  0x2e   :  { %p818_p8 = por %p817_p7, %p816_p6 }
  0x30   :  { %p819_p9 = pnand %p818_p8, %p812_p5 }
  0x32   :  { %822 = shalt.err (!%p819_p9)
}
  0x33   :  { %51 = dma.hbm_to_vmem [thread:$0]  %s1003_s3, 4096, %s46_s18, [#allocation6], %s876_s11, %s876_s11, %s877_s12  }
  0x34   :  { %s880_s16 = smov [#allocation8]   ;;  %s823_s21 = scalar_lea.hbm %s1005_s5, 2048 }
  0x35   :  { %s59_s17 = sshll.u32 %s880_s16, 4  ;;  %p824_p10 = scmp.ne.s32.totalorder %s1005_s5, %s823_s21  ;;  %s60_s17 = int_to_ptr.vmem [resolvable:$true] %s59_s17 }
  0x36   :  { %p827_p11 = scmp.lt.u32.totalorder %s823_s21, %s1005_s5 }
  0x38   :  { %p829_p12 = pnand %p827_p11, %p824_p10 }
  0x3a   :  { %832 = shalt.err (!%p829_p12)
}
  0x3b   :  { %s833_s1 = scalar_lea.vmem %s60_s17, 2048  ;;  %p838_p0 = scmp.lt.s32.totalorder %s60_s17, %s60_s17 }
  0x3c   :  { %p834_p13 = scmp.ne.s32.totalorder %s60_s17, %s833_s1  ;;  %p839_p1 = scmp.lt.s32.totalorder %s833_s1, %s833_s1 }
  0x3e   :  { %p840_p2 = por %p839_p1, %p838_p0 }
  0x40   :  { %p841_p3 = pnand %p840_p2, %p834_p13 }
  0x42   :  { %844 = shalt.err (!%p841_p3)
}
  0x43   :  { %s881_s3 = smov 64   ;;  %s882_s11 = smov 4  }
  0x44   :  { %65 = dma.hbm_to_vmem [thread:$0]  %s1005_s5, 2048, %s60_s17, [#allocation9], %s881_s3, %s881_s3, %s882_s11  }
  0x45   :  { %867 = dma.done.wait [#allocation3], 64  }
  0x46   :  { %868 = vsyncadd [#allocation3], 4294967232 }
  0x47   :  { %869 = dma.done.wait [#allocation6], 4352  }
  0x48   :  { %870 = vsyncadd [#allocation6], 4294962944 }
  0x49   :  { %871 = dma.done.wait [#allocation9], 2048  }
  0x4a   :  { %872 = vsyncadd [#allocation9], 4294965248  ;;  %v883_v0 = vmov 0   ;;  %v688_v1 = vld [vmem:[#allocation5 + $0x4] ss:$8 sps:$4 sm:$0xff]   ;;  %vm106_vm0 = vcmask 130048   ;;  %v86_v48 = vlaneseq }
  0x4b   :  { %142 = vmatprep.mubr.bf16.mxu0 %v883_v0  ;;  %v690_v2 = vld [vmem:[#allocation5] ss:$8 sps:$4 sm:$0xff]   ;;  %v81_v3 = vld [vmem:[#allocation2] sm:$0xf]  ;;  %110 = vmatprep.subr.bf16.mxu0 %v688_v1  ;;  %v693_v5 = vld [vmem:[#allocation7] ss:$8 sps:$4 sm:$0xff]  }
  0x4c   :  { %v691_v4 = vld [vmem:[#allocation7 + $0x4] ss:$8 sps:$4 sm:$0xff]   ;;  %111 = vmatpush1.bf16.msra.mxu0 %v690_v2  ;;  %v694_v6 = vld [vmem:[#allocation7 + $0x14] ss:$8 sps:$4 sm:$0xff]   ;;  %v696_v7 = vld [vmem:[#allocation7 + $0x10] ss:$8 sps:$4 sm:$0xff]  }
  0x4d   :  { %359 = vmatprep.subr.bf16.mxu1 %v691_v4  ;;  %v697_v8 = vld [vmem:[#allocation7 + $0x24] ss:$8 sps:$4 sm:$0xff]   ;;  %v699_v9 = vld [vmem:[#allocation7 + $0x20] ss:$8 sps:$4 sm:$0xff]   ;;  %v700_v10 = vld [vmem:[#allocation7 + $0x34] ss:$8 sps:$4 sm:$0xff]  }
  0x4e   :  { %360 = vmatpush1.bf16.msra.mxu1 %v693_v5  ;;  %v702_v11 = vld [vmem:[#allocation7 + $0x30] ss:$8 sps:$4 sm:$0xff]   ;;  %v703_v12 = vld [vmem:[#allocation7 + $0x44] ss:$8 sps:$4 sm:$0xff]   ;;  %v705_v13 = vld [vmem:[#allocation7 + $0x40] ss:$8 sps:$4 sm:$0xff]  }
  0x4f   :  { %606 = vmatmul.mubr.msk.bf16.vlgmr.msra.gmra.mrb[0].mxu0 %vm106_vm0, %v81_v3  ;;  %361 = vmatprep.subr.bf16.mxu1 %v694_v6  ;;  %v706_v14 = vld [vmem:[#allocation7 + $0x54] ss:$8 sps:$4 sm:$0xff]   ;;  %v708_v15 = vld [vmem:[#allocation7 + $0x50] ss:$8 sps:$4 sm:$0xff]   ;;  %v709_v16 = vld [vmem:[#allocation7 + $0x64] ss:$8 sps:$4 sm:$0xff]  }
  0x50   :  { %v711_v17 = vld [vmem:[#allocation7 + $0x60] ss:$8 sps:$4 sm:$0xff]   ;;  %v712_v18 = vld [vmem:[#allocation7 + $0x74] ss:$8 sps:$4 sm:$0xff]   ;;  %v714_v19 = vld [vmem:[#allocation7 + $0x70] ss:$8 sps:$4 sm:$0xff]  }
  0x51   :  { %v715_v20 = vld [vmem:[#allocation7 + $0x84] ss:$8 sps:$4 sm:$0xff]   ;;  %v717_v21 = vld [vmem:[#allocation7 + $0x80] ss:$8 sps:$4 sm:$0xff]   ;;  %v718_v22 = vld [vmem:[#allocation7 + $0x94] ss:$8 sps:$4 sm:$0xff]  }
  0x52   :  { %362 = vmatpush1.bf16.msra.mxu1 %v696_v7  ;;  %v720_v23 = vld [vmem:[#allocation7 + $0x90] ss:$8 sps:$4 sm:$0xff]   ;;  %v721_v24 = vld [vmem:[#allocation7 + $0xa4] ss:$8 sps:$4 sm:$0xff]   ;;  %v723_v25 = vld [vmem:[#allocation7 + $0xa0] ss:$8 sps:$4 sm:$0xff]  }
  0x53   :  { %363 = vmatprep.subr.bf16.mxu1 %v697_v8  ;;  %v724_v26 = vld [vmem:[#allocation7 + $0xb4] ss:$8 sps:$4 sm:$0xff]   ;;  %v726_v27 = vld [vmem:[#allocation7 + $0xb0] ss:$8 sps:$4 sm:$0xff]   ;;  %v727_v28 = vld [vmem:[#allocation7 + $0xc4] ss:$8 sps:$4 sm:$0xff]  }
  0x54   :  { %v729_v29 = vld [vmem:[#allocation7 + $0xc0] ss:$8 sps:$4 sm:$0xff]   ;;  %v730_v30 = vld [vmem:[#allocation7 + $0xd4] ss:$8 sps:$4 sm:$0xff]   ;;  %v732_v31 = vld [vmem:[#allocation7 + $0xd0] ss:$8 sps:$4 sm:$0xff]  }
  0x55   :  { %v733_v32 = vld [vmem:[#allocation7 + $0xe4] ss:$8 sps:$4 sm:$0xff]   ;;  %v735_v33 = vld [vmem:[#allocation7 + $0xe0] ss:$8 sps:$4 sm:$0xff]   ;;  %v736_v34 = vld [vmem:[#allocation7 + $0xf4] ss:$8 sps:$4 sm:$0xff]  }
  0x56   :  { %364 = vmatpush1.bf16.msra.mxu1 %v699_v9  ;;  %v738_v35 = vld [vmem:[#allocation7 + $0xf0] ss:$8 sps:$4 sm:$0xff]   ;;  %v739_v36 = vld [vmem:[#allocation8 + $0x40] sm:$0xff]   ;;  %v741_v38 = vld [vmem:[#allocation8 + $0x48] sm:$0xff]   ;;  %v87_v49 = vshrl.u32 %v86_v48, 7 }
  0x57   :  { %365 = vmatprep.subr.bf16.mxu1 %v700_v10  ;;  %v740_v37 = vld [vmem:[#allocation8] sm:$0xff]   ;;  %656 = vmatprep.subr.bf16.mxu0 %v739_v36  ;;  %v742_v39 = vld [vmem:[#allocation8 + $0x8] sm:$0xff]   ;;  %v743_v40 = vld [vmem:[#allocation8 + $0x50] sm:$0xff]  }
  0x58   :  { %657 = vmatpush3.bf16.msra.mxu0 %v740_v37  ;;  %v744_v41 = vld [vmem:[#allocation8 + $0x10] sm:$0xff]   ;;  %v745_v42 = vld [vmem:[#allocation8 + $0x58] sm:$0xff]   ;;  %v747_v44 = vld [vmem:[#allocation8 + $0x60] sm:$0xff]   ;;  %v88_v50 = vsub.s32 0, %v87_v49  ;;  %v92_v52 = vsub.s32 1, %v87_v49 }
  0x59   :  { %658 = vmatprep.subr.bf16.mxu0 %v741_v38  ;;  %v746_v43 = vld [vmem:[#allocation8 + $0x18] sm:$0xff]   ;;  %v748_v45 = vld [vmem:[#allocation8 + $0x20] sm:$0xff]   ;;  %v749_v46 = vld [vmem:[#allocation8 + $0x68] sm:$0xff]  }
  0x5a   :  { %366 = vmatpush1.bf16.msra.mxu1 %v702_v11  ;;  %v750_v47 = vld [vmem:[#allocation8 + $0x28] sm:$0xff]   ;;  %v751_v1 = vld [vmem:[#allocation8 + $0x70] sm:$0xff]   ;;  %v753_v3 = vld [vmem:[#allocation8 + $0x78] sm:$0xff]  }
  0x5b   :  { %367 = vmatprep.subr.bf16.mxu1 %v703_v12  ;;  %v84_v51 = vld [vmem:[%s1002_s2] sm:$0x3]  ;;  %v752_v2 = vld [vmem:[#allocation8 + $0x30] sm:$0xff]   ;;  %v754_v4 = vld [vmem:[#allocation8 + $0x38] sm:$0xff]  }
  0x5c   :  { %659 = vmatpush3.bf16.msra.mxu0 %v742_v39  ;;  %v89_v53 = vrot.slane %v84_v51, %v88_v50  ;;  %v93_v54 = vrot.slane %v84_v51, %v92_v52  ;;  %v187_v5 = vld [vmem:[%s1004_s4] sm:$0x3]  ;;  %s884_s4 = smov [#allocation10]  }
  0x5d   :  { %660 = vmatprep.subr.bf16.mxu0 %v743_v40  ;;  %v192_v6 = vrot.slane %v187_v5, %v88_v50  ;;  %v196_v7 = vrot.slane %v187_v5, %v92_v52  ;;  %s593_s30 = sshll.u32 %s884_s4, 4  ;;  %s594_s30 = int_to_ptr.vmem [resolvable:$true] %s593_s30 }
  0x5e   :  { %368 = vmatpush1.bf16.msra.mxu1 %v705_v13  ;;  %s845_s8 = scalar_lea.vmem %s594_s30, 128  ;;  %p850_p5 = scmp.lt.s32.totalorder %s594_s30, %s594_s30 }
  0x5f   :  { %369 = vmatprep.subr.bf16.mxu1 %v706_v14  ;;  %p846_p4 = scmp.ne.s32.totalorder %s594_s30, %s845_s8  ;;  %p851_p6 = scmp.lt.s32.totalorder %s845_s8, %s845_s8 }
  0x60   :  { %661 = vmatpush3.bf16.msra.mxu0 %v744_v41 }
  0x61   :  { %662 = vmatprep.subr.bf16.mxu0 %v745_v42  ;;  %p852_p7 = por %p851_p6, %p850_p5 }
  0x62   :  { %370 = vmatpush1.bf16.msra.mxu1 %v708_v15 }
  0x63   :  { %371 = vmatprep.subr.bf16.mxu1 %v709_v16  ;;  %p853_p8 = pnand %p852_p7, %p846_p4 }
  0x64   :  { %663 = vmatpush3.bf16.msra.mxu0 %v746_v43 }
  0x65   :  { %664 = vmatprep.subr.bf16.mxu0 %v747_v44 }
  0x66   :  { %372 = vmatpush1.bf16.msra.mxu1 %v711_v17 }
  0x67   :  { %373 = vmatprep.subr.bf16.mxu1 %v712_v18 }
  0x68   :  { %665 = vmatpush3.bf16.msra.mxu0 %v748_v45 }
  0x69   :  { %666 = vmatprep.subr.bf16.mxu0 %v749_v46 }
  0x6a   :  { %374 = vmatpush1.bf16.msra.mxu1 %v714_v19  ;;  %v639_v19 = vld [vmem:[%s1006_s6] ss:$0 sm:$0xff] }
  0x6b   :  { %375 = vmatprep.subr.bf16.mxu1 %v715_v20 }
  0x6c   :  { %667 = vmatpush3.bf16.msra.mxu0 %v750_v47 }
  0x6d   :  { %668 = vmatprep.subr.bf16.mxu0 %v751_v1 }
  0x6e   :  { %376 = vmatpush1.bf16.msra.mxu1 %v717_v21 }
  0x6f   :  { %377 = vmatprep.subr.bf16.mxu1 %v718_v22 }
  0x70   :  { %669 = vmatpush3.bf16.msra.mxu0 %v752_v2 }
  0x71   :  { %670 = vmatprep.subr.bf16.mxu0 %v753_v3 }
  0x72   :  { %378 = vmatpush1.bf16.msra.mxu1 %v720_v23 }
  0x73   :  { %379 = vmatprep.subr.bf16.mxu1 %v721_v24 }
  0x74   :  { %671 = vmatpush3.bf16.msra.mxu0 %v754_v4 }
  0x76   :  { %380 = vmatpush1.bf16.msra.mxu1 %v723_v25  ;;  %v583_v25 = vand.u32 127, %v86_v48 }
  0x77   :  { %381 = vmatprep.subr.bf16.mxu1 %v724_v26 }
  0x78   :  { %vm584_vm1 = vcmp.lt.s32.totalorder %v583_v25, 64 }
  0x7a   :  { %382 = vmatpush1.bf16.msra.mxu1 %v726_v27 }
  0x7b   :  { %383 = vmatprep.subr.bf16.mxu1 %v727_v28 }
  0x7e   :  { %384 = vmatpush1.bf16.msra.mxu1 %v729_v29 }
  0x7f   :  { %385 = vmatprep.subr.bf16.mxu1 %v730_v30 }
  0x82   :  { %386 = vmatpush1.bf16.msra.mxu1 %v732_v31 }
  0x83   :  { %387 = vmatprep.subr.bf16.mxu1 %v733_v32 }
  0x86   :  { %388 = vmatpush1.bf16.msra.mxu1 %v735_v33 }
  0x87   :  { %389 = vmatprep.subr.bf16.mxu1 %v736_v34 }
  0x8a   :  { %390 = vmatpush1.bf16.msra.mxu1 %v738_v35 }
 0x122   :  { %v144_v55 = vpop.f32.mrb[0].mxu0 }
 0x123   :  { %v145_v56 = vadd.f32 %v144_v55, %v89_v53  ;;  %v146_v57 = vpop.f32.mrb[1].mxu0 }
 0x124   :  { %v147_v58 = vadd.f32 %v146_v57, %v93_v54  ;;  %v148_v59 = vpop.f32.mrb[2].mxu0 }
 0x125   :  { %v151_v60 = vmax.f32 %v145_v56, 0.0  ;;  %v149_v61 = vpop.f32.mrb[3].mxu0 }
 0x126   :  { %v152_v62 = vmax.f32 %v147_v58, 0.0 }
 0x127   :  { %v153_v0 = vpack.c.bf16 %v151_v60, %v151_v60 }
 0x128   :  { %v154_v63 = vpack.c.bf16 %v152_v62, %v152_v62 }
 0x12a   :  { %391 = vmatprep.mubr.bf16.mxu1 %v154_v63 }
 0x12b   :  { %392 = vmatmul.mubr.bf16.vlgmr.msra.gmra.mrb[0].mxu1 %v153_v0 }
 0x1fe   :  { %v393_v8 = vpop.f32.mrb[0].mxu1 }
 0x1ff   :  { %v394_v9 = vadd.f32 %v393_v8, %v192_v6  ;;  %v395_v10 = vpop.f32.mrb[1].mxu1 }
 0x200   :  { %v396_v11 = vadd.f32 %v395_v10, %v196_v7  ;;  %v397_v12 = vpop.f32.mrb[2].mxu1 }
 0x201   :  { %v400_v13 = vmax.f32 %v394_v9, 0.0  ;;  %v398_v14 = vpop.f32.mrb[3].mxu1 }
 0x202   :  { %v401_v15 = vmax.f32 %v396_v11, 0.0 }
 0x203   :  { %v402_v17 = vpack.c.bf16 %v400_v13, %v400_v13 }
 0x204   :  { %v403_v16 = vpack.c.bf16 %v401_v15, %v401_v15 }
 0x206   :  { %571 = vmatprep.mubr.bf16.mxu0 %v403_v16 }
 0x207   :  { %572 = vmatmul.mubr.bf16.vlgmr.msra.gmra.mrb[4].mxu0 %v402_v17 }
 0x2da   :  { %v672_v18 = vpop.f32.mrb[4].mxu0 }
 0x2db   :  { %v673_v20 = vpop.f32.mrb[5].mxu0 }
 0x2dc   :  { %v674_v21 = vadd.f32 %v673_v20, %v672_v18  ;;  %v675_v22 = vpop.f32.mrb[6].mxu0 }
 0x2dd   :  { %v676_v23 = vpop.f32.mrb[7].mxu0 }
 0x2de   :  { %v574_v24 = vadd.f32 %v674_v21, %v639_v19 }
 0x2e0   :  { %755 = vtanh.f32 %v574_v24 }
 0x2ea   :  { %v756_v26 = vpop.eup %755 }
 0x2eb   :  { %v580_v27 = vmul.f32 3.5, %v756_v26 }
 0x2ed   :  { %v581_v28 = vadd.f32 -1.5, %v580_v27 }
 0x2ef   :  { %v585_v29 = vsel %vm584_vm1, %v574_v24, %v581_v28 }
 0x2f0   :  { %586 = vst [vmem:[#allocation10] sm:$0xff] %v585_v29 }
 0x2f1   :  { %856 = shalt.err (!%p853_p8)
}
 0x2f2   :  { %s857_s10 = scalar_lea.hbm %s1007_s7, 128 }
 0x2f3   :  { %p858_p9 = scmp.ne.s32.totalorder %s1007_s7, %s857_s10  ;;  %p861_p10 = scmp.lt.u32.totalorder %s857_s10, %s1007_s7 }
 0x2f5   :  { %p863_p11 = pnand %p861_p10, %p858_p9 }
 0x2f7   :  { %866 = shalt.err (!%p863_p11)
}
 0x2f8   :  { %596 = dma.vmem_to_hbm [thread:$0]  %s594_s30, 128, %s1007_s7, [#allocation4]  }
 0x2f9   :  { %873 = dma.done.wait [#allocation4], 128  }
 0x2fa   :  { %874 = vsyncadd [#allocation4], 4294967168 }
 0x2fb   :  { %600 = vsyncpa [#allocation3], 1 }
 0x2fc   :  { %601 = vsyncpa [#allocation6], 1 }
 0x2fd   :  { %602 = vsyncpa [#allocation9], 1 }
 0x2fe   :  { %603 = vsyncpa [#allocation4], 1 }

</bundles_post_ra>
